<compile_context>
chip_gen: v7x
topology: tpu7x:2x2x1
jax: 0.10.0
libtpu: 0.0.40
codegen_flags: <defaults>
</compile_context>

<pallas_src>
import jax
import jax.numpy as jnp
from jax.experimental import pallas as pl
from jax.experimental.pallas import tpu as pltpu

HIDDEN = 1000
OUT = 100
HIDDEN_PAD = 1024        # lane-dense (multiple of 128)
HIDDEN_CHUNK = 256       # reduction-chunk width for the two-layer path
OUT_PAD = 128            # lane-dense (multiple of 128)

MAX_BATCH_TILE = 1024    # folded path: ~85% of HBM roofline per tiled-add data
MAX_BATCH_TILE_2L = 256  # two-layer path: keeps the (tm, 256) h chunk small
MIN_SPLIT_BATCH = 16     # above this, force >= 2 grid steps (v7x two-TC sharding)
XLA_BYPASS_BATCH = 64    # below this, folded path just uses XLA (launch cost dominates)


def _round_up(x, m):
    return (x + m - 1) // m * m


def _batch_tiling(max_tile, B):
    """Pick batch tile tm (multiple of 8, or == B for tiny B) and grid size."""
    if B <= MIN_SPLIT_BATCH:
        return B, 1                                   # single block == full batch dim
    tm = min(max_tile, _round_up(pl.cdiv(B, 2), 8))   # >= 2 steps -> both v7x TCs
    return tm, pl.cdiv(B, tm)                          # ragged tail handled by masked stores


# -----------------------------------------------------------------------------
# Kernel 1 (primary inference path): single fused affine  q = x @ Wf + bf
# Valid only because there is no nonlinearity between fc1 and fc2.
# -----------------------------------------------------------------------------
def _affine_kernel(x_ref, w_ref, b_ref, q_ref):
    q = jnp.dot(x_ref[...], w_ref[...], preferred_element_type=jnp.float32)
    q_ref[...] = (q + b_ref[...]).astype(q_ref.dtype)


# -----------------------------------------------------------------------------
# Kernel 2 (spec-faithful two-layer path), hidden dim chunked over grid axis 1:
#   acc += (x @ W1[:, k] + b1[k]) @ W2[k, :]   ;   q = acc + b2  (last chunk)
# -----------------------------------------------------------------------------
def _mlp2_kernel(x_ref, w1_ref, b1_ref, w2_ref, b2_ref, q_ref, acc_ref):
    k = pl.program_id(1)

    @pl.when(k == 0)
    def _init():
        acc_ref[...] = jnp.zeros_like(acc_ref)

    h = jnp.dot(x_ref[...], w1_ref[...], preferred_element_type=jnp.float32)
    h = h + b1_ref[...]
    acc_ref[...] += jnp.dot(h, w2_ref[...], preferred_element_type=jnp.float32)

    @pl.when(k == pl.num_programs(1) - 1)
    def _finalize():
        q_ref[...] = (acc_ref[...] + b2_ref[...]).astype(q_ref.dtype)


# -----------------------------------------------------------------------------
# Wrappers
# -----------------------------------------------------------------------------
def net_forward_folded(x, wf_pad, bf_pad, *, use_pallas=None, slice_output=True):
    """x: (B, P) f32, wf_pad: (P, OUT_PAD), bf_pad: (1, OUT_PAD).

    Returns (B, OUT) if slice_output else the lane-dense (B, OUT_PAD) slab
    (cols OUT: are exact zeros -- mask before any argmax/softmax downstream).
    """
    B, P = x.shape
    if use_pallas is None:
        use_pallas = B >= XLA_BYPASS_BATCH
    if not use_pallas:
        # Tiny call: one XLA dot is already at the roofline; skip kernel launch.
        q_pad = jnp.dot(x, wf_pad, precision=jax.lax.Precision.HIGHEST) + bf_pad
    else:
        tm, bgrid = _batch_tiling(MAX_BATCH_TILE, B)
        q_pad = pl.pallas_call(
            _affine_kernel,
            out_shape=jax.ShapeDtypeStruct((B, OUT_PAD), jnp.float32),
            grid_spec=pltpu.PrefetchScalarGridSpec(
                num_scalar_prefetch=0,
                grid=(bgrid,),
                in_specs=[
                    pl.BlockSpec((tm, P), lambda i: (i, 0)),        # x tile
                    pl.BlockSpec((P, OUT_PAD), lambda i: (0, 0)),   # folded W (resident)
                    pl.BlockSpec((1, OUT_PAD), lambda i: (0, 0)),   # folded b (resident)
                ],
                out_specs=pl.BlockSpec((tm, OUT_PAD), lambda i: (i, 0)),
            ),
            compiler_params=pltpu.CompilerParams(
                dimension_semantics=("parallel",)),
        )(x, wf_pad, bf_pad)
    return q_pad[:, :OUT] if slice_output else q_pad


def net_forward_two_layer(x, w1_pad, b1_pad, w2_pad, b2_pad, *, slice_output=True):
    """Spec-faithful path keeping fc1/fc2 separate (e.g. for training)."""
    B, P = x.shape
    tm, bgrid = _batch_tiling(MAX_BATCH_TILE_2L, B)
    kgrid = HIDDEN_PAD // HIDDEN_CHUNK
    q_pad = pl.pallas_call(
        _mlp2_kernel,
        out_shape=jax.ShapeDtypeStruct((B, OUT_PAD), jnp.float32),
        grid_spec=pltpu.PrefetchScalarGridSpec(
            num_scalar_prefetch=0,
            grid=(bgrid, kgrid),                                   # reduction axis last
            in_specs=[
                pl.BlockSpec((tm, P), lambda i, k: (i, 0)),                 # x tile
                pl.BlockSpec((P, HIDDEN_CHUNK), lambda i, k: (0, k)),       # W1 chunk
                pl.BlockSpec((1, HIDDEN_CHUNK), lambda i, k: (0, k)),       # b1 chunk
                pl.BlockSpec((HIDDEN_CHUNK, OUT_PAD), lambda i, k: (k, 0)), # W2 chunk
                pl.BlockSpec((1, OUT_PAD), lambda i, k: (0, 0)),            # b2 (resident)
            ],
            out_specs=pl.BlockSpec((tm, OUT_PAD), lambda i, k: (i, 0)),
            scratch_shapes=[pltpu.VMEM((tm, OUT_PAD), jnp.float32)],        # accumulator
        ),
        compiler_params=pltpu.CompilerParams(
            dimension_semantics=("parallel", "arbitrary")),
    )(x, w1_pad, b1_pad, w2_pad, b2_pad)
    return q_pad[:, :OUT] if slice_output else q_pad


# -----------------------------------------------------------------------------
# Parameter helpers
# -----------------------------------------------------------------------------
def init_params(key, parameter_dim):
    """PyTorch-like U(-1/sqrt(fan_in), 1/sqrt(fan_in)) init.

    Weights are stored transposed relative to nn.Linear so the kernel computes
    q = (x @ W1 + b1) @ W2 + b2.
    """
    k1, k2, k3, k4 = jax.random.split(key, 4)
    bound1 = 1.0 / jnp.sqrt(jnp.float32(parameter_dim))
    bound2 = 1.0 / jnp.sqrt(jnp.float32(HIDDEN))
    w1 = jax.random.uniform(k1, (parameter_dim, HIDDEN), jnp.float32, -bound1, bound1)
    b1 = jax.random.uniform(k2, (HIDDEN,), jnp.float32, -bound1, bound1)
    w2 = jax.random.uniform(k3, (HIDDEN, OUT), jnp.float32, -bound2, bound2)
    b2 = jax.random.uniform(k4, (OUT,), jnp.float32, -bound2, bound2)
    return w1, b1, w2, b2


def pad_params(w1, b1, w2, b2):
    """Zero-pad params to lane-dense shapes (done once)."""
    P = w1.shape[0]
    w1p = jnp.zeros((P, HIDDEN_PAD), jnp.float32).at[:, :HIDDEN].set(w1)
    b1p = jnp.zeros((1, HIDDEN_PAD), jnp.float32).at[:, :HIDDEN].set(b1.reshape(1, -1))
    w2p = jnp.zeros((HIDDEN_PAD, OUT_PAD), jnp.float32).at[:HIDDEN, :OUT].set(w2)
    b2p = jnp.zeros((1, OUT_PAD), jnp.float32).at[:, :OUT].set(b2.reshape(1, -1))
    return w1p, b1p, w2p, b2p


def fold_params(w1_pad, b1_pad, w2_pad, b2_pad):
    """Fold fc1/fc2 into a single affine map (done once, inference-only path).

    Exact up to FP reordering because the reference module has no activation.
    """
    wf = jnp.dot(w1_pad, w2_pad, precision=jax.lax.Precision.HIGHEST)           # (P, OUT_PAD)
    bf = jnp.dot(b1_pad, w2_pad, precision=jax.lax.Precision.HIGHEST) + b2_pad  # (1, OUT_PAD)
    return wf, bf


def _reference(x, w1, b1, w2, b2):
    h = jnp.dot(x, w1, precision=jax.lax.Precision.HIGHEST) + b1
    return jnp.dot(h, w2, precision=jax.lax.Precision.HIGHEST) + b2


if __name__ == "__main__":
    key = jax.random.PRNGKey(0)
    k_params, k_x1, k_x2 = jax.random.split(key, 3)

    parameter_dim = 32
    w1, b1, w2, b2 = init_params(k_params, parameter_dim)

    # One-time parameter preparation (padding + layer folding).
    w1p, b1p, w2p, b2p = pad_params(w1, b1, w2, b2)
    wf, bf = fold_params(w1p, b1p, w2p, b2p)

    # --- Small batch (matches the module's typical single-state call) ---------
    x_small = jax.random.normal(k_x1, (2, parameter_dim), jnp.float32)
    q_ref_s = _reference(x_small, w1, b1, w2, b2)

    q_fold_s = jax.block_until_ready(
        net_forward_folded(x_small, wf, bf, use_pallas=True))       # force the kernel
    q_two_s = jax.block_until_ready(
        net_forward_two_layer(x_small, w1p, b1p, w2p, b2p))
    q_auto_s = jax.block_until_ready(
        net_forward_folded(x_small, wf, bf))                        # auto -> XLA bypass

    assert q_fold_s.shape == (2, OUT)
    assert q_two_s.shape == (2, OUT)
    assert jnp.allclose(q_fold_s, q_ref_s, atol=3e-3, rtol=3e-3)
    assert jnp.allclose(q_two_s, q_ref_s, atol=3e-3, rtol=3e-3)
    assert jnp.allclose(q_auto_s, q_ref_s, atol=3e-3, rtol=3e-3)

    # --- Larger batch: multi-step grid + ragged tail (masked stores) ----------
    x_big = jax.random.normal(k_x2, (300, parameter_dim), jnp.float32)
    q_ref_b = _reference(x_big, w1, b1, w2, b2)

    q_fold_b = jax.block_until_ready(net_forward_folded(x_big, wf, bf))
    q_two_b_pad = jax.block_until_ready(
        net_forward_two_layer(x_big, w1p, b1p, w2p, b2p, slice_output=False))

    assert q_fold_b.shape == (300, OUT)
    assert q_two_b_pad.shape == (300, OUT_PAD)
    assert jnp.allclose(q_fold_b, q_ref_b, atol=3e-3, rtol=3e-3)
    assert jnp.allclose(q_two_b_pad[:, :OUT], q_ref_b, atol=3e-3, rtol=3e-3)
    assert jnp.all(q_two_b_pad[:, OUT:] == 0.0)   # padded cols are exact zeros

    print("KERNEL_OK")
</pallas_src>

<mosaic_0001>
module attributes {stable_mosaic.version = 11 : i64} {
  func.func @_affine_kernel(%arg0: i32, %arg1: memref<2x32xf32, #tpu.memory_space<vmem>>, %arg2: memref<32x128xf32, #tpu.memory_space<vmem>>, %arg3: memref<1x128xf32, #tpu.memory_space<vmem>>, %arg4: memref<2x128xf32, #tpu.memory_space<vmem>>) attributes {dimension_semantics = [#tpu.dimension_semantics<parallel>], iteration_bounds = array<i64: 1>, scalar_prefetch = 0 : i64, scratch_operands = 0 : i64, tpu.core_type = #tpu.core_type<tc>, window_params = [{transform_indices = @transform_0, window_bounds = array<i64: 2, 32>}, {pipeline_mode = #tpu.pipeline_mode<synchronous>, transform_indices = @transform_1, window_bounds = array<i64: 32, 128>}, {pipeline_mode = #tpu.pipeline_mode<synchronous>, transform_indices = @transform_2, window_bounds = array<i64: 1, 128>}, {transform_indices = @transform_3, window_bounds = array<i64: 2, 128>}]} {
    %c0 = arith.constant 0 : index
    %c0_0 = arith.constant 0 : index
    %0 = vector.load %arg1[%c0, %c0_0] : memref<2x32xf32, #tpu.memory_space<vmem>>, vector<2x32xf32>
    %c0_1 = arith.constant 0 : index
    %c0_2 = arith.constant 0 : index
    %1 = vector.load %arg2[%c0_1, %c0_2] : memref<32x128xf32, #tpu.memory_space<vmem>>, vector<32x128xf32>
    %cst = arith.constant dense<0.000000e+00> : vector<2x128xf32>
    %2 = tpu.matmul %0, %1, %cst {dimension_numbers = #tpu.dot_dimension_numbers<[1], [0], [0], [1], [0, 0, 1, 1], [], []>} : vector<2x32xf32>, vector<32x128xf32>, vector<2x128xf32> -> vector<2x128xf32>
    %c0_3 = arith.constant 0 : index
    %c0_4 = arith.constant 0 : index
    %3 = vector.load %arg3[%c0_3, %c0_4] : memref<1x128xf32, #tpu.memory_space<vmem>>, vector<1x128xf32>
    %4 = vector.broadcast %3 : vector<1x128xf32> to vector<2x128xf32>
    %5 = arith.addf %2, %4 : vector<2x128xf32>
    %c0_5 = arith.constant 0 : index
    %c0_6 = arith.constant 0 : index
    %6 = vector.load %arg4[%c0_5, %c0_6] : memref<2x128xf32, #tpu.memory_space<vmem>>, vector<2x128xf32>
    tpu.vector_store %arg4[%c0_5, %c0_6], %5 {strides = array<i32>} : memref<2x128xf32, #tpu.memory_space<vmem>>, vector<2x128xf32>,
    return
  }
  func.func @transform_0(%arg0: i32) -> (i32, i32) {
    %c0_i32 = arith.constant 0 : i32
    %c0_i32_0 = arith.constant 0 : i32
    return %arg0, %c0_i32 : i32, i32
  }
  func.func @transform_1(%arg0: i32) -> (i32, i32) {
    %c0_i32 = arith.constant 0 : i32
    %c0_i32_0 = arith.constant 0 : i32
    %c0_i32_1 = arith.constant 0 : i32
    return %c0_i32, %c0_i32_0 : i32, i32
  }
  func.func @transform_2(%arg0: i32) -> (i32, i32) {
    %c0_i32 = arith.constant 0 : i32
    %c0_i32_0 = arith.constant 0 : i32
    %c0_i32_1 = arith.constant 0 : i32
    return %c0_i32, %c0_i32_0 : i32, i32
  }
  func.func @transform_3(%arg0: i32) -> (i32, i32) {
    %c0_i32 = arith.constant 0 : i32
    %c0_i32_0 = arith.constant 0 : i32
    return %arg0, %c0_i32 : i32, i32
  }
}

</mosaic_0001>

<bundles_post_ra>
// kernel: tpu_custom_call.1
= control target key start
LH: loop header
LB: loop body
LE: loop exit
PB: predicated region body
PF: predicated region fallthrough
CT: control target
= control target key end

     0   :  { %8 = vsyncpa [#allocation3], 0  ;;  %s322_s0 = inlined_call_operand.hbm [shape: f32[2,32], index: 0, kind: input, shape index: {}]   ;;  %s323_s1 = inlined_call_operand.hbm [shape: f32[32,128], index: 1, kind: input, shape index: {}]   ;;  %s324_s2 = inlined_call_operand.vmem [shape: f32[1,128], index: 2, kind: input, shape index: {}]   ;;  %s325_s3 = inlined_call_operand.hbm [shape: f32[2,128], index: 3, kind: output, shape index: {}]  }
   0x1   :  { %9 = vsyncpa [#allocation6], 0 }
   0x2   :  { %10 = vsyncpa [#allocation4], 0  ;;  %s248_s12 = smov [#allocation2]   ;;  %s249_s14 = smov [#allocation5]  }
   0x3   :  { %s17_s13 = sshll.u32 %s248_s12, 4  ;;  %s26_s15 = sshll.u32 %s249_s14, 4  ;;  %s18_s13 = int_to_ptr.vmem [resolvable:$true] %s17_s13  ;;  %s276_s15 = int_to_ptr.vmem [resolvable:$true] %s26_s15 }
   0x4   :  { %s176_s18 = scalar_lea.hbm %s322_s0, 32 }
   0x5   :  { %p177_p0 = scmp.ne.s32.totalorder %s322_s0, %s176_s18  ;;  %p180_p1 = scmp.lt.u32.totalorder %s176_s18, %s322_s0 }
   0x7   :  { %p182_p2 = pnand %p180_p1, %p177_p0 }
   0x9   :  { %185 = shalt.err (!%p182_p2)
}
   0xa   :  { %s186_s23 = scalar_lea.vmem %s18_s13, 32  ;;  %p191_p4 = scmp.lt.s32.totalorder %s18_s13, %s18_s13 }
   0xb   :  { %p187_p3 = scmp.ne.s32.totalorder %s18_s13, %s186_s23  ;;  %p192_p5 = scmp.lt.s32.totalorder %s186_s23, %s186_s23 }
   0xd   :  { %p193_p6 = por %p192_p5, %p191_p4 }
   0xf   :  { %p194_p7 = pnand %p193_p6, %p187_p3 }
  0x11   :  { %197 = shalt.err (!%p194_p7)
}
  0x12   :  { %20 = dma.hbm_to_vmem [thread:$0]  %s322_s0, 32, %s18_s13, [#allocation3]  }
  0x13   :  { %s198_s28 = scalar_lea.hbm %s323_s1, 512 }
  0x14   :  { %p199_p8 = scmp.ne.s32.totalorder %s323_s1, %s198_s28  ;;  %p202_p9 = scmp.lt.u32.totalorder %s198_s28, %s323_s1 }
  0x16   :  { %p204_p10 = pnand %p202_p9, %p199_p8 }
  0x18   :  { %207 = shalt.err (!%p204_p10)
}
  0x19   :  { %s208_s6 = scalar_lea.vmem %s276_s15, 512  ;;  %p213_p12 = scmp.lt.s32.totalorder %s276_s15, %s276_s15 }
  0x1a   :  { %p209_p11 = scmp.ne.s32.totalorder %s276_s15, %s208_s6  ;;  %p214_p13 = scmp.lt.s32.totalorder %s208_s6, %s208_s6 }
  0x1c   :  { %p215_p0 = por %p214_p13, %p213_p12 }
  0x1e   :  { %p216_p1 = pnand %p215_p0, %p209_p11 }
  0x20   :  { %219 = shalt.err (!%p216_p1)
}
  0x21   :  { %s250_s0 = smov 128   ;;  %s251_s7 = smov 8  }
  0x22   :  { %32 = dma.hbm_to_vmem [thread:$0]  %s323_s1, 512, %s276_s15, [#allocation6], %s250_s0, %s250_s0, %s251_s7  }
  0x23   :  { %242 = dma.done.wait [#allocation3], 32  }
  0x24   :  { %243 = vsyncadd [#allocation3], 4294967264 }
  0x25   :  { %244 = dma.done.wait [#allocation6], 512  }
  0x26   :  { %245 = vsyncadd [#allocation6], 4294966784  ;;  %v252_v0 = vmov 0.0|0.0   ;;  %vm253_vm0 = vmmov 0   ;;  %v254_v1 = vmov 0.0   ;;  %v42_v2 = vld [vmem:[#allocation5] sm:$0xff] }
  0x27   :  { %162 = vmatprep.subr.bf16.mxu0 %v252_v0  ;;  %159 = vmatprep.mubr.msk.f32.mxu0 %vm253_vm0, %v254_v1  ;;  %v43_v3 = vld [vmem:[#allocation5 + $0x8] sm:$0xff]  ;;  %v44_v4 = vld [vmem:[#allocation5 + $0x10] sm:$0xff]  ;;  %v45_v6 = vld [vmem:[#allocation5 + $0x18] sm:$0xff]  ;;  %vm53_vm1 = vcmask 261120   ;;  %s255_s11 = smov [#allocation7]  }
  0x28   :  { %v163_v5 = vpack.c.bf16 %v43_v3, %v42_v2  ;;  %v166_v7 = vpack.c.bf16 %v45_v6, %v44_v4  ;;  %v41_v8 = vld [vmem:[#allocation2] sm:$0x3]  ;;  %s134_s12 = sshll.u32 %s255_s11, 4  ;;  %s135_s12 = int_to_ptr.vmem [resolvable:$true] %s134_s12 }
  0x29   :  { %v144_v9 = vld [vmem:[%s324_s2] ss:$0 sm:$0xff]  ;;  %s220_s13 = scalar_lea.vmem %s135_s12, 32  ;;  %p225_p3 = scmp.lt.s32.totalorder %s135_s12, %s135_s12 }
  0x2a   :  { %164 = vmatpush3.bf16.msra.mxu0 %v163_v5  ;;  %p221_p2 = scmp.ne.s32.totalorder %s135_s12, %s220_s13  ;;  %p226_p4 = scmp.lt.s32.totalorder %s220_s13, %s220_s13 }
  0x2b   :  { %165 = vmatprep.subr.bf16.mxu0 %v252_v0 }
  0x2c   :  { %p227_p5 = por %p226_p4, %p225_p3 }
  0x2e   :  { %167 = vmatpush3.bf16.msra.mxu0 %v166_v7  ;;  %p228_p6 = pnand %p227_p5, %p221_p2 }
  0x31   :  { %160 = vmatmul.mubr.msk.f32.vlgmr.msra.gmra.mrb[0].mxu0 %vm53_vm1, %v41_v8 }
 0x104   :  { %v123_v10 = vpop.f32.mrb[0].mxu0 }
 0x105   :  { %v124_v11 = vadd.f32 %v144_v9, %v123_v10  ;;  %v161_v12 = vpop.f32.mrb[1].mxu0 }
 0x107   :  { %127 = vst [vmem:[#allocation7] sm:$0x3] %v124_v11 }
 0x108   :  { %231 = shalt.err (!%p228_p6)
}
 0x109   :  { %s232_s16 = scalar_lea.hbm %s325_s3, 32 }
 0x10a   :  { %p233_p7 = scmp.ne.s32.totalorder %s325_s3, %s232_s16  ;;  %p236_p8 = scmp.lt.u32.totalorder %s232_s16, %s325_s3 }
 0x10c   :  { %p238_p9 = pnand %p236_p8, %p233_p7 }
 0x10e   :  { %241 = shalt.err (!%p238_p9)
}
 0x10f   :  { %137 = dma.vmem_to_hbm [thread:$0]  %s135_s12, 32, %s325_s3, [#allocation4]  }
 0x110   :  { %246 = dma.done.wait [#allocation4], 32  }
 0x111   :  { %247 = vsyncadd [#allocation4], 4294967264 }
 0x112   :  { %141 = vsyncpa [#allocation3], 1 }
 0x113   :  { %142 = vsyncpa [#allocation6], 1 }
 0x114   :  { %143 = vsyncpa [#allocation4], 1 }

</bundles_post_ra>
